<compile_context>
chip_gen: v7x
topology: tpu7x:2x2x1
jax: 0.10.0
libtpu: 0.0.40
codegen_flags: <defaults>
</compile_context>

<pallas_src>
import jax
import jax.numpy as jnp
from jax.experimental import pallas as pl
from jax.experimental.pallas import tpu as pltpu

# Logical (PyTorch) feature sizes and their lane-padded counterparts.
IN_F, H1_F, H2_F, OUT_F = 245, 120, 84, 1
IN_P, H1_P, H2_P, OUT_P = 256, 128, 128, 128


def mlp_kernel(x_ref, w1_ref, b1_ref, w2_ref, b2_ref, w3_ref, b3_ref, o_ref):
    # All operands are lane-aligned; padded weight rows/cols and bias lanes are
    # exactly zero, so the padded lanes stay zero through every layer.
    h1 = jnp.tanh(
        jnp.dot(x_ref[...], w1_ref[...], preferred_element_type=jnp.float32)
        + b1_ref[...]
    )
    h2 = jnp.tanh(
        jnp.dot(h1, w2_ref[...], preferred_element_type=jnp.float32)
        + b2_ref[...]
    )
    h3 = jnp.maximum(
        jnp.dot(h2, w3_ref[...], preferred_element_type=jnp.float32)
        + b3_ref[...],
        0.0,
    )
    o_ref[...] = h3.astype(o_ref.dtype)


def _round_up(n, m):
    return ((n + m - 1) // m) * m


def _pad2(a, rows, cols):
    return jnp.pad(a, ((0, rows - a.shape[0]), (0, cols - a.shape[1])))


def net_forward(x, params, *, tb=512):
    """Pallas forward of the 245->120->84->1 MLP (tanh, tanh, relu).

    params: (w1 (245,120), b1 (1,120), w2 (120,84), b2 (1,84),
             w3 (84,1),    b3 (1,1)) -- weights stored pre-transposed (in,out).
    """
    w1, b1, w2, b2, w3, b3 = params
    B = x.shape[0]

    # Zero-pad parameters to lane multiples (numerically exact).
    w1p = _pad2(w1, IN_P, H1_P)
    b1p = _pad2(b1, 1, H1_P)
    w2p = _pad2(w2, H1_P, H2_P)
    b2p = _pad2(b2, 1, H2_P)
    w3p = _pad2(w3, H2_P, OUT_P)
    b3p = _pad2(b3, 1, OUT_P)

    # Batch tiling: TB rows per grid step (multiple of 8 sublanes).
    # Per-step x tile is TB*256*4B (x2 buffers) + ~260 KB resident weights:
    # well inside every generation's scoped-VMEM default for TB <= 2048.
    TB = min(tb, _round_up(B, 8))
    B_pad = _round_up(B, TB)
    xp = jnp.pad(x, ((0, B_pad - B), (0, IN_P - IN_F)))

    out = pl.pallas_call(
        mlp_kernel,
        out_shape=jax.ShapeDtypeStruct((B_pad, OUT_P), jnp.float32),
        grid=(B_pad // TB,),
        in_specs=[
            pl.BlockSpec((TB, IN_P), lambda i: (i, 0)),    # x: pipelined tiles
            pl.BlockSpec((IN_P, H1_P), lambda i: (0, 0)),  # weights/biases stay
            pl.BlockSpec((1, H1_P), lambda i: (0, 0)),     # VMEM-resident
            pl.BlockSpec((H1_P, H2_P), lambda i: (0, 0)),
            pl.BlockSpec((1, H2_P), lambda i: (0, 0)),
            pl.BlockSpec((H2_P, OUT_P), lambda i: (0, 0)),
            pl.BlockSpec((1, OUT_P), lambda i: (0, 0)),
        ],
        out_specs=pl.BlockSpec((TB, OUT_P), lambda i: (i, 0)),  # lane-dense out
        compiler_params=pltpu.CompilerParams(
            dimension_semantics=("parallel",)  # megacore sharding on v7x
        ),
    )(xp, w1p, b1p, w2p, b2p, w3p, b3p)

    # Strip batch padding and lane padding outside the kernel.
    return out[:B, :OUT_F]


def init_params(key):
    """Deterministic parameter init mimicking nn.Linear shapes.

    PyTorch stores weight as (out, in); we store the transpose (in, out).
    """
    ks = jax.random.split(key, 6)

    def linear(kw, kb, fan_in, fan_out):
        bound = 1.0 / jnp.sqrt(fan_in)
        w = jax.random.uniform(kw, (fan_in, fan_out), jnp.float32, -bound, bound)
        b = jax.random.uniform(kb, (1, fan_out), jnp.float32, -bound, bound)
        return w, b

    w1, b1 = linear(ks[0], ks[1], IN_F, H1_F)
    w2, b2 = linear(ks[2], ks[3], H1_F, H2_F)
    w3, b3 = linear(ks[4], ks[5], H2_F, OUT_F)
    return (w1, b1, w2, b2, w3, b3)


if __name__ == "__main__":
    key = jax.random.PRNGKey(0)
    k_x, k_p = jax.random.split(key)

    B = 8
    x = jax.random.normal(k_x, (B, IN_F), dtype=jnp.float32)
    params = init_params(k_p)

    out = net_forward(x, params)
    out = jax.block_until_ready(out)

    # Reference check in plain JAX (same math as the PyTorch module).
    w1, b1, w2, b2, w3, b3 = params
    ref = jnp.tanh(x @ w1 + b1)
    ref = jnp.tanh(ref @ w2 + b2)
    ref = jnp.maximum(ref @ w3 + b3, 0.0)
    assert out.shape == (B, OUT_F)
    assert jnp.allclose(out, ref, atol=1e-5, rtol=1e-5)

    print("KERNEL_OK")
</pallas_src>

<mosaic_0001>
module attributes {stable_mosaic.version = 11 : i64} {
  func.func @mlp_kernel(%arg0: i32, %arg1: memref<8x256xf32, #tpu.memory_space<vmem>>, %arg2: memref<256x128xf32, #tpu.memory_space<vmem>>, %arg3: memref<1x128xf32, #tpu.memory_space<vmem>>, %arg4: memref<128x128xf32, #tpu.memory_space<vmem>>, %arg5: memref<1x128xf32, #tpu.memory_space<vmem>>, %arg6: memref<128x128xf32, #tpu.memory_space<vmem>>, %arg7: memref<1x128xf32, #tpu.memory_space<vmem>>, %arg8: memref<8x128xf32, #tpu.memory_space<vmem>>) attributes {dimension_semantics = [#tpu.dimension_semantics<parallel>], iteration_bounds = array<i64: 1>, scalar_prefetch = 0 : i64, scratch_operands = 0 : i64, tpu.core_type = #tpu.core_type<tc>, window_params = [{transform_indices = @transform_0, window_bounds = array<i64: 8, 256>}, {pipeline_mode = #tpu.pipeline_mode<synchronous>, transform_indices = @transform_1, window_bounds = array<i64: 256, 128>}, {pipeline_mode = #tpu.pipeline_mode<synchronous>, transform_indices = @transform_2, window_bounds = array<i64: 1, 128>}, {pipeline_mode = #tpu.pipeline_mode<synchronous>, transform_indices = @transform_3, window_bounds = array<i64: 128, 128>}, {pipeline_mode = #tpu.pipeline_mode<synchronous>, transform_indices = @transform_4, window_bounds = array<i64: 1, 128>}, {pipeline_mode = #tpu.pipeline_mode<synchronous>, transform_indices = @transform_5, window_bounds = array<i64: 128, 128>}, {pipeline_mode = #tpu.pipeline_mode<synchronous>, transform_indices = @transform_6, window_bounds = array<i64: 1, 128>}, {transform_indices = @transform_7, window_bounds = array<i64: 8, 128>}]} {
    %c0 = arith.constant 0 : index
    %c0_0 = arith.constant 0 : index
    %0 = vector.load %arg1[%c0, %c0_0] : memref<8x256xf32, #tpu.memory_space<vmem>>, vector<8x256xf32>
    %c0_1 = arith.constant 0 : index
    %c0_2 = arith.constant 0 : index
    %1 = vector.load %arg2[%c0_1, %c0_2] : memref<256x128xf32, #tpu.memory_space<vmem>>, vector<256x128xf32>
    %cst = arith.constant dense<0.000000e+00> : vector<8x128xf32>
    %2 = tpu.matmul %0, %1, %cst {dimension_numbers = #tpu.dot_dimension_numbers<[1], [0], [0], [1], [0, 0, 1, 1], [], []>} : vector<8x256xf32>, vector<256x128xf32>, vector<8x128xf32> -> vector<8x128xf32>
    %c0_3 = arith.constant 0 : index
    %c0_4 = arith.constant 0 : index
    %3 = vector.load %arg3[%c0_3, %c0_4] : memref<1x128xf32, #tpu.memory_space<vmem>>, vector<1x128xf32>
    %4 = vector.broadcast %3 : vector<1x128xf32> to vector<8x128xf32>
    %5 = arith.addf %2, %4 : vector<8x128xf32>
    %6 = math.tanh %5 : vector<8x128xf32>
    %c0_5 = arith.constant 0 : index
    %c0_6 = arith.constant 0 : index
    %7 = vector.load %arg4[%c0_5, %c0_6] : memref<128x128xf32, #tpu.memory_space<vmem>>, vector<128x128xf32>
    %cst_7 = arith.constant dense<0.000000e+00> : vector<8x128xf32>
    %8 = tpu.matmul %6, %7, %cst_7 {dimension_numbers = #tpu.dot_dimension_numbers<[1], [0], [0], [1], [0, 0, 1, 1], [], []>} : vector<8x128xf32>, vector<128x128xf32>, vector<8x128xf32> -> vector<8x128xf32>
    %c0_8 = arith.constant 0 : index
    %c0_9 = arith.constant 0 : index
    %9 = vector.load %arg5[%c0_8, %c0_9] : memref<1x128xf32, #tpu.memory_space<vmem>>, vector<1x128xf32>
    %10 = vector.broadcast %9 : vector<1x128xf32> to vector<8x128xf32>
    %11 = arith.addf %8, %10 : vector<8x128xf32>
    %12 = math.tanh %11 : vector<8x128xf32>
    %c0_10 = arith.constant 0 : index
    %c0_11 = arith.constant 0 : index
    %13 = vector.load %arg6[%c0_10, %c0_11] : memref<128x128xf32, #tpu.memory_space<vmem>>, vector<128x128xf32>
    %cst_12 = arith.constant dense<0.000000e+00> : vector<8x128xf32>
    %14 = tpu.matmul %12, %13, %cst_12 {dimension_numbers = #tpu.dot_dimension_numbers<[1], [0], [0], [1], [0, 0, 1, 1], [], []>} : vector<8x128xf32>, vector<128x128xf32>, vector<8x128xf32> -> vector<8x128xf32>
    %c0_13 = arith.constant 0 : index
    %c0_14 = arith.constant 0 : index
    %15 = vector.load %arg7[%c0_13, %c0_14] : memref<1x128xf32, #tpu.memory_space<vmem>>, vector<1x128xf32>
    %16 = vector.broadcast %15 : vector<1x128xf32> to vector<8x128xf32>
    %17 = arith.addf %14, %16 : vector<8x128xf32>
    %cst_15 = arith.constant 0.000000e+00 : f32
    %18 = vector.broadcast %cst_15 : f32 to vector<8x128xf32>
    %19 = arith.maximumf %17, %18 : vector<8x128xf32>
    %c0_16 = arith.constant 0 : index
    %c0_17 = arith.constant 0 : index
    %20 = vector.load %arg8[%c0_16, %c0_17] : memref<8x128xf32, #tpu.memory_space<vmem>>, vector<8x128xf32>
    tpu.vector_store %arg8[%c0_16, %c0_17], %19 {strides = array<i32>} : memref<8x128xf32, #tpu.memory_space<vmem>>, vector<8x128xf32>,
    return
  }
  func.func @transform_0(%arg0: i32) -> (i32, i32) {
    %c0_i32 = arith.constant 0 : i32
    %c0_i32_0 = arith.constant 0 : i32
    return %arg0, %c0_i32 : i32, i32
  }
  func.func @transform_1(%arg0: i32) -> (i32, i32) {
    %c0_i32 = arith.constant 0 : i32
    %c0_i32_0 = arith.constant 0 : i32
    %c0_i32_1 = arith.constant 0 : i32
    return %c0_i32, %c0_i32_0 : i32, i32
  }
  func.func @transform_2(%arg0: i32) -> (i32, i32) {
    %c0_i32 = arith.constant 0 : i32
    %c0_i32_0 = arith.constant 0 : i32
    %c0_i32_1 = arith.constant 0 : i32
    return %c0_i32, %c0_i32_0 : i32, i32
  }
  func.func @transform_3(%arg0: i32) -> (i32, i32) {
    %c0_i32 = arith.constant 0 : i32
    %c0_i32_0 = arith.constant 0 : i32
    %c0_i32_1 = arith.constant 0 : i32
    return %c0_i32, %c0_i32_0 : i32, i32
  }
  func.func @transform_4(%arg0: i32) -> (i32, i32) {
    %c0_i32 = arith.constant 0 : i32
    %c0_i32_0 = arith.constant 0 : i32
    %c0_i32_1 = arith.constant 0 : i32
    return %c0_i32, %c0_i32_0 : i32, i32
  }
  func.func @transform_5(%arg0: i32) -> (i32, i32) {
    %c0_i32 = arith.constant 0 : i32
    %c0_i32_0 = arith.constant 0 : i32
    %c0_i32_1 = arith.constant 0 : i32
    return %c0_i32, %c0_i32_0 : i32, i32
  }
  func.func @transform_6(%arg0: i32) -> (i32, i32) {
    %c0_i32 = arith.constant 0 : i32
    %c0_i32_0 = arith.constant 0 : i32
    %c0_i32_1 = arith.constant 0 : i32
    return %c0_i32, %c0_i32_0 : i32, i32
  }
  func.func @transform_7(%arg0: i32) -> (i32, i32) {
    %c0_i32 = arith.constant 0 : i32
    %c0_i32_0 = arith.constant 0 : i32
    return %arg0, %c0_i32 : i32, i32
  }
}

</mosaic_0001>

<bundles_post_ra>
// kernel: tpu_custom_call.1
= control target key start
LH: loop header
LB: loop body
LE: loop exit
PB: predicated region body
PF: predicated region fallthrough
CT: control target
= control target key end

     0   :  { %12 = vsyncpa [#allocation3], 0  ;;  %s896_s0 = inlined_call_operand.hbm [shape: f32[8,256], index: 0, kind: input, shape index: {}]   ;;  %s897_s1 = inlined_call_operand.hbm [shape: f32[256,128], index: 1, kind: input, shape index: {}]   ;;  %s898_s2 = inlined_call_operand.vmem [shape: f32[1,128], index: 2, kind: input, shape index: {}]   ;;  %s899_s3 = inlined_call_operand.hbm [shape: f32[128,128], index: 3, kind: input, shape index: {}]   ;;  %s900_s4 = inlined_call_operand.vmem [shape: f32[1,128], index: 4, kind: input, shape index: {}]   ;;  %s901_s5 = inlined_call_operand.hbm [shape: f32[128,128], index: 5, kind: input, shape index: {}]   ;;  %s902_s6 = inlined_call_operand.vmem [shape: f32[1,128], index: 6, kind: input, shape index: {}]   ;;  %s903_s7 = inlined_call_operand.hbm [shape: f32[8,128], index: 7, kind: output, shape index: {}]  }
   0x1   :  { %13 = vsyncpa [#allocation6], 0 }
   0x2   :  { %14 = vsyncpa [#allocation9], 0 }
   0x3   :  { %15 = vsyncpa [#allocation4], 0  ;;  %s752_s24 = smov [#allocation5]   ;;  %s634_s28 = scalar_lea.hbm %s897_s1, 4096 }
   0x4   :  { %s31_s25 = sshll.u32 %s752_s24, 4  ;;  %p635_p0 = scmp.ne.s32.totalorder %s897_s1, %s634_s28  ;;  %s32_s25 = int_to_ptr.vmem [resolvable:$true] %s31_s25 }
   0x5   :  { %p638_p1 = scmp.lt.u32.totalorder %s634_s28, %s897_s1 }
   0x7   :  { %p640_p2 = pnand %p638_p1, %p635_p0 }
   0x9   :  { %643 = shalt.err (!%p640_p2)
}
   0xa   :  { %s644_s10 = scalar_lea.vmem %s32_s25, 4096  ;;  %p649_p4 = scmp.lt.s32.totalorder %s32_s25, %s32_s25 }
   0xb   :  { %p645_p3 = scmp.ne.s32.totalorder %s32_s25, %s644_s10  ;;  %p650_p5 = scmp.lt.s32.totalorder %s644_s10, %s644_s10 }
   0xd   :  { %p651_p6 = por %p650_p5, %p649_p4 }
   0xf   :  { %p652_p7 = pnand %p651_p6, %p645_p3 }
  0x11   :  { %655 = shalt.err (!%p652_p7)
}
  0x12   :  { %s753_s11 = smov 128   ;;  %s754_s12 = smov 8  }
  0x13   :  { %37 = dma.hbm_to_vmem [thread:$0]  %s897_s1, 4096, %s32_s25, [#allocation6], %s753_s11, %s753_s11, %s754_s12  }
  0x14   :  { %s755_s15 = smov [#allocation2]   ;;  %s756_s17 = smov [#allocation7]  }
  0x15   :  { %s22_s16 = sshll.u32 %s755_s15, 4  ;;  %s45_s18 = sshll.u32 %s756_s17, 4  ;;  %s23_s16 = int_to_ptr.vmem [resolvable:$true] %s22_s16  ;;  %s46_s18 = int_to_ptr.vmem [resolvable:$true] %s45_s18 }
  0x16   :  { %s656_s21 = scalar_lea.hbm %s896_s0, 256 }
  0x17   :  { %p657_p8 = scmp.ne.s32.totalorder %s896_s0, %s656_s21  ;;  %p660_p9 = scmp.lt.u32.totalorder %s656_s21, %s896_s0 }
  0x19   :  { %p662_p10 = pnand %p660_p9, %p657_p8 }
  0x1b   :  { %665 = shalt.err (!%p662_p10)
}
  0x1c   :  { %s666_s1 = scalar_lea.vmem %s23_s16, 256  ;;  %p671_p12 = scmp.lt.s32.totalorder %s23_s16, %s23_s16 }
  0x1d   :  { %p667_p11 = scmp.ne.s32.totalorder %s23_s16, %s666_s1  ;;  %p672_p13 = scmp.lt.s32.totalorder %s666_s1, %s666_s1 }
  0x1f   :  { %p673_p0 = por %p672_p13, %p671_p12 }
  0x21   :  { %p674_p1 = pnand %p673_p0, %p667_p11 }
  0x23   :  { %677 = shalt.err (!%p674_p1)
}
  0x24   :  { %25 = dma.hbm_to_vmem [thread:$0]  %s896_s0, 256, %s23_s16, [#allocation3]  }
  0x25   :  { %s678_s30 = scalar_lea.hbm %s899_s3, 2048 }
  0x26   :  { %p679_p2 = scmp.ne.s32.totalorder %s899_s3, %s678_s30  ;;  %p682_p3 = scmp.lt.u32.totalorder %s678_s30, %s899_s3 }
  0x28   :  { %p684_p4 = pnand %p682_p3, %p679_p2 }
  0x2a   :  { %687 = shalt.err (!%p684_p4)
}
  0x2b   :  { %s688_s14 = scalar_lea.vmem %s46_s18, 2048  ;;  %p693_p6 = scmp.lt.s32.totalorder %s46_s18, %s46_s18 }
  0x2c   :  { %p689_p5 = scmp.ne.s32.totalorder %s46_s18, %s688_s14  ;;  %p694_p7 = scmp.lt.s32.totalorder %s688_s14, %s688_s14 }
  0x2e   :  { %p695_p8 = por %p694_p7, %p693_p6 }
  0x30   :  { %p696_p9 = pnand %p695_p8, %p689_p5 }
  0x32   :  { %699 = shalt.err (!%p696_p9)
}
  0x33   :  { %51 = dma.hbm_to_vmem [thread:$0]  %s899_s3, 2048, %s46_s18, [#allocation6], %s753_s11, %s753_s11, %s754_s12  }
  0x34   :  { %s757_s16 = smov [#allocation8]   ;;  %s700_s21 = scalar_lea.hbm %s901_s5, 2048 }
  0x35   :  { %s59_s17 = sshll.u32 %s757_s16, 4  ;;  %p701_p10 = scmp.ne.s32.totalorder %s901_s5, %s700_s21  ;;  %s60_s17 = int_to_ptr.vmem [resolvable:$true] %s59_s17 }
  0x36   :  { %p704_p11 = scmp.lt.u32.totalorder %s700_s21, %s901_s5 }
  0x38   :  { %p706_p12 = pnand %p704_p11, %p701_p10 }
  0x3a   :  { %709 = shalt.err (!%p706_p12)
}
  0x3b   :  { %s710_s1 = scalar_lea.vmem %s60_s17, 2048  ;;  %p715_p0 = scmp.lt.s32.totalorder %s60_s17, %s60_s17 }
  0x3c   :  { %p711_p13 = scmp.ne.s32.totalorder %s60_s17, %s710_s1  ;;  %p716_p1 = scmp.lt.s32.totalorder %s710_s1, %s710_s1 }
  0x3e   :  { %p717_p2 = por %p716_p1, %p715_p0 }
  0x40   :  { %p718_p3 = pnand %p717_p2, %p711_p13 }
  0x42   :  { %721 = shalt.err (!%p718_p3)
}
  0x43   :  { %65 = dma.hbm_to_vmem [thread:$0]  %s901_s5, 2048, %s60_s17, [#allocation9], %s753_s11, %s753_s11, %s754_s12  }
  0x44   :  { %744 = dma.done.wait [#allocation3], 256  }
  0x45   :  { %745 = vsyncadd [#allocation3], 4294967040 }
  0x46   :  { %746 = dma.done.wait [#allocation6], 6144  }
  0x47   :  { %747 = vsyncadd [#allocation6], 4294961152 }
  0x48   :  { %748 = dma.done.wait [#allocation9], 2048  }
  0x49   :  { %749 = vsyncadd [#allocation9], 4294965248  ;;  %v758_v0 = vmov 0.0|0.0   ;;  %v98_v1 = vld [vmem:[#allocation5 + $0x80] sm:$0xff]  ;;  %v99_v2 = vld [vmem:[#allocation5 + $0x88] sm:$0xff]  ;;  %vm759_vm0 = vmmov 0  }
  0x4a   :  { %572 = vmatprep.subr.bf16.mxu1 %v758_v0  ;;  %v82_v3 = vld [vmem:[#allocation5] sm:$0xff]  ;;  %v540_v4 = vpack.c.bf16 %v99_v2, %v98_v1  ;;  %v83_v5 = vld [vmem:[#allocation5 + $0x8] sm:$0xff]  ;;  %v100_v6 = vld [vmem:[#allocation5 + $0x90] sm:$0xff]  ;;  %s761_s28 = smov [#allocation10]  }
  0x4b   :  { %v101_v7 = vld [vmem:[#allocation5 + $0x98] sm:$0xff]  ;;  %v542_v8 = vpack.c.bf16 %v83_v5, %v82_v3  ;;  %v84_v10 = vld [vmem:[#allocation5 + $0x10] sm:$0xff]  ;;  %v102_v12 = vld [vmem:[#allocation5 + $0xa0] sm:$0xff]  ;;  %s387_s29 = sshll.u32 %s761_s28, 4  ;;  %s388_s29 = int_to_ptr.vmem [resolvable:$true] %s387_s29 }
  0x4c   :  { %v544_v9 = vpack.c.bf16 %v101_v7, %v100_v6  ;;  %v85_v11 = vld [vmem:[#allocation5 + $0x18] sm:$0xff]  ;;  %541 = vmatprep.subr.bf16.mxu0 %v540_v4  ;;  %v103_v13 = vld [vmem:[#allocation5 + $0xa8] sm:$0xff]  ;;  %v86_v16 = vld [vmem:[#allocation5 + $0x20] sm:$0xff]  ;;  %s722_s30 = scalar_lea.vmem %s388_s29, 128  ;;  %p727_p5 = scmp.lt.s32.totalorder %s388_s29, %s388_s29 }
  0x4d   :  { %543 = vmatpush3.bf16.msra.mxu0 %v542_v8  ;;  %v546_v14 = vpack.c.bf16 %v85_v11, %v84_v10  ;;  %v548_v15 = vpack.c.bf16 %v103_v13, %v102_v12  ;;  %v87_v17 = vld [vmem:[#allocation5 + $0x28] sm:$0xff]  ;;  %v104_v18 = vld [vmem:[#allocation5 + $0xb0] sm:$0xff]  ;;  %v105_v19 = vld [vmem:[#allocation5 + $0xb8] sm:$0xff]  ;;  %v760_v11 = vmov 0.0   ;;  %p723_p4 = scmp.ne.s32.totalorder %s388_s29, %s722_s30  ;;  %p728_p6 = scmp.lt.s32.totalorder %s722_s30, %s722_s30 }
  0x4e   :  { %545 = vmatprep.subr.bf16.mxu0 %v544_v9  ;;  %v550_v20 = vpack.c.bf16 %v87_v17, %v86_v16  ;;  %v552_v21 = vpack.c.bf16 %v105_v19, %v104_v18  ;;  %v88_v22 = vld [vmem:[#allocation5 + $0x30] sm:$0xff]  ;;  %v89_v23 = vld [vmem:[#allocation5 + $0x38] sm:$0xff]  ;;  %v106_v24 = vld [vmem:[#allocation5 + $0xc0] sm:$0xff]  ;;  %502 = vmatprep.mubr.msk.f32.mxu1 %vm759_vm0, %v760_v11 }
  0x4f   :  { %v107_v25 = vld [vmem:[#allocation5 + $0xc8] sm:$0xff]  ;;  %v81_v26 = vld [vmem:[#allocation2 + $0x8] sm:$0xff]  ;;  %v192_v27 = vld [vmem:[#allocation7] sm:$0xff]  ;;  %v554_v29 = vpack.c.bf16 %v89_v23, %v88_v22  ;;  %p729_p7 = por %p728_p6, %p727_p5 }
  0x50   :  { %185 = vmatprep.mubr.f32.mxu0 %v81_v26  ;;  %v193_v28 = vld [vmem:[#allocation7 + $0x8] sm:$0xff]  ;;  %v194_v31 = vld [vmem:[#allocation7 + $0x10] sm:$0xff]  ;;  %v195_v32 = vld [vmem:[#allocation7 + $0x18] sm:$0xff]  ;;  %v556_v33 = vpack.c.bf16 %v107_v25, %v106_v24 }
  0x51   :  { %547 = vmatpush3.bf16.msra.mxu0 %v546_v14  ;;  %v573_v30 = vpack.c.bf16 %v193_v28, %v192_v27  ;;  %v90_v34 = vld [vmem:[#allocation5 + $0x40] sm:$0xff]  ;;  %v91_v35 = vld [vmem:[#allocation5 + $0x48] sm:$0xff]  ;;  %v108_v36 = vld [vmem:[#allocation5 + $0xd0] sm:$0xff]  ;;  %v576_v38 = vpack.c.bf16 %v195_v32, %v194_v31  ;;  %p730_p8 = pnand %p729_p7, %p723_p4 }
  0x52   :  { %549 = vmatprep.subr.bf16.mxu0 %v548_v15  ;;  %v109_v37 = vld [vmem:[#allocation5 + $0xd8] sm:$0xff]  ;;  %v196_v39 = vld [vmem:[#allocation7 + $0x20] sm:$0xff]  ;;  %v197_v40 = vld [vmem:[#allocation7 + $0x28] sm:$0xff]  ;;  %v558_v41 = vpack.c.bf16 %v91_v35, %v90_v34 }
  0x53   :  { %574 = vmatpush3.bf16.msra.mxu1 %v573_v30  ;;  %v560_v42 = vpack.c.bf16 %v109_v37, %v108_v36  ;;  %v92_v43 = vld [vmem:[#allocation5 + $0x50] sm:$0xff]  ;;  %v93_v44 = vld [vmem:[#allocation5 + $0x58] sm:$0xff]  ;;  %v110_v45 = vld [vmem:[#allocation5 + $0xe0] sm:$0xff]  ;;  %v579_v47 = vpack.c.bf16 %v197_v40, %v196_v39 }
  0x54   :  { %575 = vmatprep.subr.bf16.mxu1 %v758_v0  ;;  %v111_v46 = vld [vmem:[#allocation5 + $0xe8] sm:$0xff]  ;;  %v198_v48 = vld [vmem:[#allocation7 + $0x30] sm:$0xff]  ;;  %v199_v49 = vld [vmem:[#allocation7 + $0x38] sm:$0xff]  ;;  %v562_v50 = vpack.c.bf16 %v93_v44, %v92_v43 }
  0x55   :  { %551 = vmatpush3.bf16.msra.mxu0 %v550_v20  ;;  %v564_v51 = vpack.c.bf16 %v111_v46, %v110_v45  ;;  %v94_v52 = vld [vmem:[#allocation5 + $0x60] sm:$0xff]  ;;  %v95_v53 = vld [vmem:[#allocation5 + $0x68] sm:$0xff]  ;;  %v112_v54 = vld [vmem:[#allocation5 + $0xf0] sm:$0xff]  ;;  %v582_v56 = vpack.c.bf16 %v199_v49, %v198_v48 }
  0x56   :  { %553 = vmatprep.subr.bf16.mxu0 %v552_v21  ;;  %v113_v55 = vld [vmem:[#allocation5 + $0xf8] sm:$0xff]  ;;  %v566_v57 = vpack.c.bf16 %v95_v53, %v94_v52  ;;  %v96_v59 = vld [vmem:[#allocation5 + $0x70] sm:$0xff]  ;;  %v200_v63 = vld [vmem:[#allocation7 + $0x40] sm:$0xff] }
  0x57   :  { %577 = vmatpush3.bf16.msra.mxu1 %v576_v38  ;;  %v568_v58 = vpack.c.bf16 %v113_v55, %v112_v54  ;;  %v97_v60 = vld [vmem:[#allocation5 + $0x78] sm:$0xff]  ;;  %v80_v62 = vld [vmem:[#allocation2] sm:$0xff]  ;;  %v201_v1 = vld [vmem:[#allocation7 + $0x48] sm:$0xff] }
  0x58   :  { %578 = vmatprep.subr.bf16.mxu1 %v758_v0  ;;  %v570_v61 = vpack.c.bf16 %v97_v60, %v96_v59  ;;  %v585_v2 = vpack.c.bf16 %v201_v1, %v200_v63  ;;  %v202_v3 = vld [vmem:[#allocation7 + $0x50] sm:$0xff]  ;;  %v203_v4 = vld [vmem:[#allocation7 + $0x58] sm:$0xff]  ;;  %v204_v6 = vld [vmem:[#allocation7 + $0x60] sm:$0xff] }
  0x59   :  { %555 = vmatpush3.bf16.msra.mxu0 %v554_v29  ;;  %v588_v5 = vpack.c.bf16 %v203_v4, %v202_v3  ;;  %v205_v7 = vld [vmem:[#allocation7 + $0x68] sm:$0xff]  ;;  %v206_v9 = vld [vmem:[#allocation7 + $0x70] sm:$0xff]  ;;  %v207_v10 = vld [vmem:[#allocation7 + $0x78] sm:$0xff] }
  0x5a   :  { %557 = vmatprep.subr.bf16.mxu0 %v556_v33  ;;  %v591_v8 = vpack.c.bf16 %v205_v7, %v204_v6  ;;  %v594_v12 = vpack.c.bf16 %v207_v10, %v206_v9  ;;  %v286_v13 = vld [vmem:[#allocation8] sm:$0xff]  ;;  %v287_v14 = vld [vmem:[#allocation8 + $0x8] sm:$0xff]  ;;  %v288_v15 = vld [vmem:[#allocation8 + $0x10] sm:$0xff] }
  0x5b   :  { %580 = vmatpush3.bf16.msra.mxu1 %v579_v47  ;;  %v597_v16 = vpack.c.bf16 %v287_v14, %v286_v13  ;;  %v289_v17 = vld [vmem:[#allocation8 + $0x18] sm:$0xff]  ;;  %v290_v19 = vld [vmem:[#allocation8 + $0x20] sm:$0xff]  ;;  %v291_v20 = vld [vmem:[#allocation8 + $0x28] sm:$0xff] }
  0x5c   :  { %581 = vmatprep.subr.bf16.mxu1 %v758_v0  ;;  %v600_v18 = vpack.c.bf16 %v289_v17, %v288_v15  ;;  %v603_v21 = vpack.c.bf16 %v291_v20, %v290_v19  ;;  %v292_v22 = vld [vmem:[#allocation8 + $0x30] sm:$0xff]  ;;  %v293_v23 = vld [vmem:[#allocation8 + $0x38] sm:$0xff]  ;;  %v294_v25 = vld [vmem:[#allocation8 + $0x40] sm:$0xff] }
  0x5d   :  { %559 = vmatpush3.bf16.msra.mxu0 %v558_v41  ;;  %v606_v24 = vpack.c.bf16 %v293_v23, %v292_v22  ;;  %v295_v26 = vld [vmem:[#allocation8 + $0x48] sm:$0xff]  ;;  %v398_v29 = vld [vmem:[%s898_s2] ss:$0 sm:$0xff]  ;;  %v297_v35 = vld [vmem:[#allocation8 + $0x58] sm:$0xff] }
  0x5e   :  { %561 = vmatprep.subr.bf16.mxu0 %v560_v42  ;;  %v609_v27 = vpack.c.bf16 %v295_v26, %v294_v25  ;;  %v296_v34 = vld [vmem:[#allocation8 + $0x50] sm:$0xff]  ;;  %v298_v37 = vld [vmem:[#allocation8 + $0x60] sm:$0xff]  ;;  %v299_v38 = vld [vmem:[#allocation8 + $0x68] sm:$0xff] }
  0x5f   :  { %583 = vmatpush3.bf16.msra.mxu1 %v582_v56  ;;  %v612_v36 = vpack.c.bf16 %v297_v35, %v296_v34  ;;  %v615_v39 = vpack.c.bf16 %v299_v38, %v298_v37  ;;  %v300_v40 = vld [vmem:[#allocation8 + $0x70] sm:$0xff]  ;;  %v301_v41 = vld [vmem:[#allocation8 + $0x78] sm:$0xff] }
  0x60   :  { %584 = vmatprep.subr.bf16.mxu1 %v758_v0  ;;  %v618_v42 = vpack.c.bf16 %v301_v41, %v300_v40  ;;  %v399_v43 = vld [vmem:[%s900_s4] ss:$0 sm:$0xff] }
  0x61   :  { %563 = vmatpush3.bf16.msra.mxu0 %v562_v50  ;;  %v400_v48 = vld [vmem:[%s902_s6] ss:$0 sm:$0xff] }
  0x62   :  { %565 = vmatprep.subr.bf16.mxu0 %v564_v51 }
  0x63   :  { %586 = vmatpush3.bf16.msra.mxu1 %v585_v2 }
  0x64   :  { %587 = vmatprep.subr.bf16.mxu1 %v758_v0 }
  0x65   :  { %567 = vmatpush3.bf16.msra.mxu0 %v566_v57 }
  0x66   :  { %569 = vmatprep.subr.bf16.mxu0 %v568_v58 }
  0x67   :  { %589 = vmatpush3.bf16.msra.mxu1 %v588_v5 }
  0x68   :  { %590 = vmatprep.subr.bf16.mxu1 %v758_v0 }
  0x69   :  { %571 = vmatpush3.bf16.msra.mxu0 %v570_v61 }
  0x6a   :  { %596 = vmatprep.subr.bf16.mxu0 %v758_v0 }
  0x6b   :  { %592 = vmatpush3.bf16.msra.mxu1 %v591_v8 }
  0x6c   :  { %186 = vmatmul.mubr.f32.vlgmr.msra.gmra.mrb[0].mxu0 %v80_v62  ;;  %593 = vmatprep.subr.bf16.mxu1 %v758_v0 }
  0x6d   :  { %537 = vmatprep.mubr.msk.f32.mxu0 %vm759_vm0, %v760_v11  ;;  %598 = vmatpush3.bf16.msra.mxu0 %v597_v16 }
  0x6e   :  { %599 = vmatprep.subr.bf16.mxu0 %v758_v0 }
  0x6f   :  { %595 = vmatpush3.bf16.msra.mxu1 %v594_v12 }
  0x71   :  { %601 = vmatpush3.bf16.msra.mxu0 %v600_v18 }
  0x72   :  { %602 = vmatprep.subr.bf16.mxu0 %v758_v0 }
  0x75   :  { %604 = vmatpush3.bf16.msra.mxu0 %v603_v21 }
  0x76   :  { %605 = vmatprep.subr.bf16.mxu0 %v758_v0 }
  0x79   :  { %607 = vmatpush3.bf16.msra.mxu0 %v606_v24 }
  0x7a   :  { %608 = vmatprep.subr.bf16.mxu0 %v758_v0 }
  0x7d   :  { %610 = vmatpush3.bf16.msra.mxu0 %v609_v27 }
  0x7e   :  { %611 = vmatprep.subr.bf16.mxu0 %v758_v0 }
  0x81   :  { %613 = vmatpush3.bf16.msra.mxu0 %v612_v36 }
  0x82   :  { %614 = vmatprep.subr.bf16.mxu0 %v758_v0 }
  0x85   :  { %616 = vmatpush3.bf16.msra.mxu0 %v615_v39 }
  0x86   :  { %617 = vmatprep.subr.bf16.mxu0 %v758_v0 }
  0x89   :  { %619 = vmatpush3.bf16.msra.mxu0 %v618_v42 }
 0x13f   :  { %v433_v28 = vpop.f32.mrb[0].mxu0 }
 0x140   :  { %v434_v30 = vpop.f32.mrb[1].mxu0 }
 0x141   :  { %v435_v31 = vadd.f32 %v434_v30, %v433_v28 }
 0x143   :  { %v188_v32 = vadd.f32 %v435_v31, %v398_v29 }
 0x145   :  { %630 = vtanh.f32 %v188_v32 }
 0x14f   :  { %v631_v33 = vpop.eup %630 }
 0x150   :  { %503 = vmatmul.mubr.f32.vlgmr.msra.gmra.mrb[0].mxu1 %v631_v33 }
 0x223   :  { %v281_v44 = vpop.f32.mrb[0].mxu1 }
 0x224   :  { %v282_v45 = vadd.f32 %v399_v43, %v281_v44  ;;  %v504_v46 = vpop.f32.mrb[1].mxu1 }
 0x226   :  { %632 = vtanh.f32 %v282_v45 }
 0x230   :  { %v633_v47 = vpop.eup %632 }
 0x231   :  { %538 = vmatmul.mubr.f32.vlgmr.msra.gmra.mrb[2].mxu0 %v633_v47 }
 0x304   :  { %v375_v49 = vpop.f32.mrb[2].mxu0 }
 0x305   :  { %v376_v50 = vadd.f32 %v400_v48, %v375_v49  ;;  %v539_v0 = vpop.f32.mrb[3].mxu0 }
 0x307   :  { %v379_v51 = vmax.f32 %v376_v50, 0.0 }
 0x309   :  { %380 = vst [vmem:[#allocation10] sm:$0xff] %v379_v51 }
 0x30a   :  { %733 = shalt.err (!%p730_p8)
}
 0x30b   :  { %s734_s9 = scalar_lea.hbm %s903_s7, 128 }
 0x30c   :  { %p735_p9 = scmp.ne.s32.totalorder %s903_s7, %s734_s9  ;;  %p738_p10 = scmp.lt.u32.totalorder %s734_s9, %s903_s7 }
 0x30e   :  { %p740_p11 = pnand %p738_p10, %p735_p9 }
 0x310   :  { %743 = shalt.err (!%p740_p11)
}
 0x311   :  { %390 = dma.vmem_to_hbm [thread:$0]  %s388_s29, 128, %s903_s7, [#allocation4]  }
 0x312   :  { %750 = dma.done.wait [#allocation4], 128  }
 0x313   :  { %751 = vsyncadd [#allocation4], 4294967168 }
 0x314   :  { %394 = vsyncpa [#allocation3], 1 }
 0x315   :  { %395 = vsyncpa [#allocation6], 1 }
 0x316   :  { %396 = vsyncpa [#allocation9], 1 }
 0x317   :  { %397 = vsyncpa [#allocation4], 1 }

</bundles_post_ra>
